<compile_context>
chip_gen: v7x
topology: tpu7x:2x2x1
jax: 0.10.0
libtpu: 0.0.40
codegen_flags: <defaults>
</compile_context>

<pallas_src>
import functools

import jax
import jax.numpy as jnp
import numpy as np
from jax.experimental import pallas as pl
from jax.experimental.pallas import tpu as pltpu


def _round_up(x, m):
    return (x + m - 1) // m * m


def _make_kernel(filter_sizes, m_tile, d_pad, f_pad, out_dtype):
    max_fsz = max(filter_sizes)
    n = len(filter_sizes)

    def kernel(*refs):
        x_ref, halo_ref = refs[0], refs[1]
        w_refs = refs[2:2 + n]
        b_refs = refs[2 + n:2 + 2 * n]
        o_refs = refs[2 + 2 * n:2 + 3 * n]

        # (m_tile + HALO, d_pad) bf16 tile of the flattened embedding.
        xc = jnp.concatenate([x_ref[...], halo_ref[...]], axis=0)
        # im2row slab built once per tile: row m = [x[m], x[m+1], ..., x[m+max_fsz-1]].
        xw = jnp.concatenate([xc[f:f + m_tile, :] for f in range(max_fsz)],
                             axis=1)                         # (m_tile, max_fsz*d_pad)
        for i, fsz in enumerate(filter_sizes):
            acc = jnp.dot(xw[:, :fsz * d_pad], w_refs[i][...],
                          preferred_element_type=jnp.float32)
            acc = jnp.maximum(acc + b_refs[i][...], 0.0)     # bias + ReLU epilogue
            o_refs[i][...] = acc.astype(out_dtype)

    return kernel


def cnn_model_forward(emb, weights, biases, filter_sizes, *, m_tile=512,
                      compute_dtype=jnp.bfloat16):
    """emb: (B, S, D) f32.  weights[i]: (F, 1, fsz_i, D)  (PyTorch Conv2d layout).
    biases[i]: (F,).  Returns [(B, S - fsz_i + 1, F) f32] like CNN_Model.forward."""
    filter_sizes = tuple(int(f) for f in filter_sizes)
    B, S, D = emb.shape
    F = weights[0].shape[0]
    max_fsz = max(filter_sizes)
    assert min(filter_sizes) >= 1 and max_fsz <= S

    D_pad = _round_up(D, 128)
    F_pad = _round_up(F, 128)
    HALO = max(8, _round_up(max_fsz - 1, 8))

    M = B * S
    m_tile = max(HALO, min(m_tile, _round_up(M, HALO)))
    m_tile = _round_up(m_tile, HALO)
    num_blocks = pl.cdiv(M, m_tile)
    M_grid = num_blocks * m_tile

    # Flattened, padded, bf16 embedding: (M_grid + HALO, D_pad).
    x = emb.reshape(M, D).astype(compute_dtype)
    x = jnp.pad(x, ((0, M_grid + HALO - M), (0, D_pad - D)))

    # Weights -> (fsz*D_pad, F_pad) bf16 (im2row layout); biases -> (1, F_pad) f32.
    w_flats, b_rows = [], []
    for w, b, fsz in zip(weights, biases, filter_sizes):
        wk = jnp.transpose(w[:, 0], (1, 2, 0))               # (fsz, D, F)
        wk = jnp.pad(wk, ((0, 0), (0, D_pad - D), (0, F_pad - F)))
        w_flats.append(wk.reshape(fsz * D_pad, F_pad).astype(compute_dtype))
        b_rows.append(jnp.pad(b.astype(jnp.float32), (0, F_pad - F)).reshape(1, F_pad))

    in_specs = (
        [pl.BlockSpec((m_tile, D_pad), lambda i: (i, 0)),
         # Halo: the HALO rows immediately after the current tile (same HBM array).
         pl.BlockSpec((HALO, D_pad), lambda i: ((i + 1) * (m_tile // HALO), 0))]
        + [pl.BlockSpec((fsz * D_pad, F_pad), lambda i: (0, 0))
           for fsz in filter_sizes]
        + [pl.BlockSpec((1, F_pad), lambda i: (0, 0)) for _ in filter_sizes]
    )
    out_specs = tuple(pl.BlockSpec((m_tile, F_pad), lambda i: (i, 0))
                      for _ in filter_sizes)
    out_shape = tuple(jax.ShapeDtypeStruct((M_grid, F_pad), jnp.float32)
                      for _ in filter_sizes)

    kernel = _make_kernel(filter_sizes, m_tile, D_pad, F_pad, jnp.float32)

    outs = pl.pallas_call(
        kernel,
        out_shape=out_shape,
        grid=(num_blocks,),
        in_specs=in_specs,
        out_specs=out_specs,
        compiler_params=pltpu.CompilerParams(
            dimension_semantics=("parallel",),
            vmem_limit_bytes=32 * 1024 * 1024),
    )(x, x, *w_flats, *b_rows)

    # Crop row padding + cross-example windows + F padding -> (B, L_out, F) per fsz.
    results = []
    for y, fsz in zip(outs, filter_sizes):
        L = S - fsz + 1
        results.append(y[:M].reshape(B, S, F_pad)[:, :L, :F])
    return results


def _reference(emb, weights, biases, filter_sizes, compute_dtype=jnp.bfloat16):
    """Pure-JAX reference with the same bf16-input / f32-accumulation scheme."""
    B, S, D = emb.shape
    x = emb.astype(compute_dtype)
    outs = []
    for w, b, fsz in zip(weights, biases, filter_sizes):
        wk = jnp.transpose(w[:, 0], (1, 2, 0)).astype(compute_dtype)  # (fsz, D, F)
        L = S - fsz + 1
        acc = jnp.zeros((B, L, w.shape[0]), jnp.float32)
        for f in range(fsz):
            acc = acc + jnp.einsum("bld,df->blf", x[:, f:f + L, :], wk[f],
                                   preferred_element_type=jnp.float32)
        outs.append(jnp.maximum(acc + b.astype(jnp.float32)[None, None, :], 0.0))
    return outs


if __name__ == "__main__":
    # Small shapes consistent with the module: emb (B, S, in_dim), 3 conv branches.
    B, S, in_dim = 4, 24, 48
    num_filter = 36
    filter_sizes = (3, 4, 5)

    key = jax.random.PRNGKey(0)
    keys = jax.random.split(key, 1 + 2 * len(filter_sizes))
    emb = jax.random.normal(keys[0], (B, S, in_dim), jnp.float32)
    weights, biases = [], []
    for i, fsz in enumerate(filter_sizes):
        kw, kb = keys[1 + 2 * i], keys[2 + 2 * i]
        weights.append(0.1 * jax.random.normal(kw, (num_filter, 1, fsz, in_dim),
                                               jnp.float32))
        biases.append(0.1 * jax.random.normal(kb, (num_filter,), jnp.float32))

    fwd = jax.jit(functools.partial(cnn_model_forward, filter_sizes=filter_sizes))
    outs = jax.block_until_ready(fwd(emb, weights, biases))

    refs = _reference(emb, weights, biases, filter_sizes)
    for o, r, fsz in zip(outs, refs, filter_sizes):
        assert o.shape == (B, S - fsz + 1, num_filter), o.shape
        np.testing.assert_allclose(np.asarray(o), np.asarray(r),
                                   rtol=2e-2, atol=2e-2)

    print("KERNEL_OK")
</pallas_src>

<mosaic_0001>
module attributes {stable_mosaic.version = 11 : i64} {
  func.func @kernel(%arg0: i32, %arg1: memref<96x128xbf16, #tpu.memory_space<vmem>>, %arg2: memref<8x128xbf16, #tpu.memory_space<vmem>>, %arg3: memref<384x128xbf16, #tpu.memory_space<vmem>>, %arg4: memref<512x128xbf16, #tpu.memory_space<vmem>>, %arg5: memref<640x128xbf16, #tpu.memory_space<vmem>>, %arg6: memref<1x128xf32, #tpu.memory_space<vmem>>, %arg7: memref<1x128xf32, #tpu.memory_space<vmem>>, %arg8: memref<1x128xf32, #tpu.memory_space<vmem>>, %arg9: memref<96x128xf32, #tpu.memory_space<vmem>>, %arg10: memref<96x128xf32, #tpu.memory_space<vmem>>, %arg11: memref<96x128xf32, #tpu.memory_space<vmem>>) attributes {dimension_semantics = [#tpu.dimension_semantics<parallel>], iteration_bounds = array<i64: 1>, scalar_prefetch = 0 : i64, scratch_operands = 0 : i64, tpu.core_type = #tpu.core_type<tc>, window_params = [{transform_indices = @transform_0, window_bounds = array<i64: 96, 128>}, {transform_indices = @transform_1, window_bounds = array<i64: 8, 128>}, {pipeline_mode = #tpu.pipeline_mode<synchronous>, transform_indices = @transform_2, window_bounds = array<i64: 384, 128>}, {pipeline_mode = #tpu.pipeline_mode<synchronous>, transform_indices = @transform_3, window_bounds = array<i64: 512, 128>}, {pipeline_mode = #tpu.pipeline_mode<synchronous>, transform_indices = @transform_4, window_bounds = array<i64: 640, 128>}, {pipeline_mode = #tpu.pipeline_mode<synchronous>, transform_indices = @transform_5, window_bounds = array<i64: 1, 128>}, {pipeline_mode = #tpu.pipeline_mode<synchronous>, transform_indices = @transform_6, window_bounds = array<i64: 1, 128>}, {pipeline_mode = #tpu.pipeline_mode<synchronous>, transform_indices = @transform_7, window_bounds = array<i64: 1, 128>}, {transform_indices = @transform_8, window_bounds = array<i64: 96, 128>}, {transform_indices = @transform_9, window_bounds = array<i64: 96, 128>}, {transform_indices = @transform_10, window_bounds = array<i64: 96, 128>}]} {
    %c0 = arith.constant 0 : index
    %c0_0 = arith.constant 0 : index
    %0 = vector.load %arg1[%c0, %c0_0] : memref<96x128xbf16, #tpu.memory_space<vmem>>, vector<96x128xbf16>
    %c0_1 = arith.constant 0 : index
    %c0_2 = arith.constant 0 : index
    %1 = vector.load %arg2[%c0_1, %c0_2] : memref<8x128xbf16, #tpu.memory_space<vmem>>, vector<8x128xbf16>
    %2 = tpu.concatenate %0, %1 in 0 : vector<96x128xbf16>, vector<8x128xbf16> -> vector<104x128xbf16>
    %3 = vector.extract_strided_slice %2 {offsets = [0, 0], sizes = [96, 128], strides = [1, 1]} : vector<104x128xbf16> to vector<96x128xbf16>
    %4 = vector.extract_strided_slice %2 {offsets = [1, 0], sizes = [96, 128], strides = [1, 1]} : vector<104x128xbf16> to vector<96x128xbf16>
    %5 = vector.extract_strided_slice %2 {offsets = [2, 0], sizes = [96, 128], strides = [1, 1]} : vector<104x128xbf16> to vector<96x128xbf16>
    %6 = vector.extract_strided_slice %2 {offsets = [3, 0], sizes = [96, 128], strides = [1, 1]} : vector<104x128xbf16> to vector<96x128xbf16>
    %7 = vector.extract_strided_slice %2 {offsets = [4, 0], sizes = [96, 128], strides = [1, 1]} : vector<104x128xbf16> to vector<96x128xbf16>
    %8 = tpu.concatenate %3, %4, %5, %6, %7 in 1 : vector<96x128xbf16>, vector<96x128xbf16>, vector<96x128xbf16>, vector<96x128xbf16>, vector<96x128xbf16> -> vector<96x640xbf16>
    %9 = vector.extract_strided_slice %8 {offsets = [0, 0], sizes = [96, 384], strides = [1, 1]} : vector<96x640xbf16> to vector<96x384xbf16>
    %c0_3 = arith.constant 0 : index
    %c0_4 = arith.constant 0 : index
    %10 = vector.load %arg3[%c0_3, %c0_4] : memref<384x128xbf16, #tpu.memory_space<vmem>>, vector<384x128xbf16>
    %cst = arith.constant dense<0.000000e+00> : vector<96x128xf32>
    %11 = tpu.matmul %9, %10, %cst {dimension_numbers = #tpu.dot_dimension_numbers<[1], [0], [0], [1], [0, 0, 1, 1], [], []>} : vector<96x384xbf16>, vector<384x128xbf16>, vector<96x128xf32> -> vector<96x128xf32>
    %c0_5 = arith.constant 0 : index
    %c0_6 = arith.constant 0 : index
    %12 = vector.load %arg6[%c0_5, %c0_6] : memref<1x128xf32, #tpu.memory_space<vmem>>, vector<1x128xf32>
    %13 = vector.broadcast %12 : vector<1x128xf32> to vector<96x128xf32>
    %14 = arith.addf %11, %13 : vector<96x128xf32>
    %cst_7 = arith.constant 0.000000e+00 : f32
    %15 = vector.broadcast %cst_7 : f32 to vector<96x128xf32>
    %16 = arith.maximumf %14, %15 : vector<96x128xf32>
    %c0_8 = arith.constant 0 : index
    %c0_9 = arith.constant 0 : index
    %17 = vector.load %arg9[%c0_8, %c0_9] : memref<96x128xf32, #tpu.memory_space<vmem>>, vector<96x128xf32>
    tpu.vector_store %arg9[%c0_8, %c0_9], %16 {strides = array<i32>} : memref<96x128xf32, #tpu.memory_space<vmem>>, vector<96x128xf32>,
    %18 = vector.extract_strided_slice %8 {offsets = [0, 0], sizes = [96, 512], strides = [1, 1]} : vector<96x640xbf16> to vector<96x512xbf16>
    %c0_10 = arith.constant 0 : index
    %c0_11 = arith.constant 0 : index
    %19 = vector.load %arg4[%c0_10, %c0_11] : memref<512x128xbf16, #tpu.memory_space<vmem>>, vector<512x128xbf16>
    %cst_12 = arith.constant dense<0.000000e+00> : vector<96x128xf32>
    %20 = tpu.matmul %18, %19, %cst_12 {dimension_numbers = #tpu.dot_dimension_numbers<[1], [0], [0], [1], [0, 0, 1, 1], [], []>} : vector<96x512xbf16>, vector<512x128xbf16>, vector<96x128xf32> -> vector<96x128xf32>
    %c0_13 = arith.constant 0 : index
    %c0_14 = arith.constant 0 : index
    %21 = vector.load %arg7[%c0_13, %c0_14] : memref<1x128xf32, #tpu.memory_space<vmem>>, vector<1x128xf32>
    %22 = vector.broadcast %21 : vector<1x128xf32> to vector<96x128xf32>
    %23 = arith.addf %20, %22 : vector<96x128xf32>
    %cst_15 = arith.constant 0.000000e+00 : f32
    %24 = vector.broadcast %cst_15 : f32 to vector<96x128xf32>
    %25 = arith.maximumf %23, %24 : vector<96x128xf32>
    %c0_16 = arith.constant 0 : index
    %c0_17 = arith.constant 0 : index
    %26 = vector.load %arg10[%c0_16, %c0_17] : memref<96x128xf32, #tpu.memory_space<vmem>>, vector<96x128xf32>
    tpu.vector_store %arg10[%c0_16, %c0_17], %25 {strides = array<i32>} : memref<96x128xf32, #tpu.memory_space<vmem>>, vector<96x128xf32>,
    %c0_18 = arith.constant 0 : index
    %c0_19 = arith.constant 0 : index
    %27 = vector.load %arg5[%c0_18, %c0_19] : memref<640x128xbf16, #tpu.memory_space<vmem>>, vector<640x128xbf16>
    %cst_20 = arith.constant dense<0.000000e+00> : vector<96x128xf32>
    %28 = tpu.matmul %8, %27, %cst_20 {dimension_numbers = #tpu.dot_dimension_numbers<[1], [0], [0], [1], [0, 0, 1, 1], [], []>} : vector<96x640xbf16>, vector<640x128xbf16>, vector<96x128xf32> -> vector<96x128xf32>
    %c0_21 = arith.constant 0 : index
    %c0_22 = arith.constant 0 : index
    %29 = vector.load %arg8[%c0_21, %c0_22] : memref<1x128xf32, #tpu.memory_space<vmem>>, vector<1x128xf32>
    %30 = vector.broadcast %29 : vector<1x128xf32> to vector<96x128xf32>
    %31 = arith.addf %28, %30 : vector<96x128xf32>
    %cst_23 = arith.constant 0.000000e+00 : f32
    %32 = vector.broadcast %cst_23 : f32 to vector<96x128xf32>
    %33 = arith.maximumf %31, %32 : vector<96x128xf32>
    %c0_24 = arith.constant 0 : index
    %c0_25 = arith.constant 0 : index
    %34 = vector.load %arg11[%c0_24, %c0_25] : memref<96x128xf32, #tpu.memory_space<vmem>>, vector<96x128xf32>
    tpu.vector_store %arg11[%c0_24, %c0_25], %33 {strides = array<i32>} : memref<96x128xf32, #tpu.memory_space<vmem>>, vector<96x128xf32>,
    return
  }
  func.func @transform_0(%arg0: i32) -> (i32, i32) {
    %c0_i32 = arith.constant 0 : i32
    %c0_i32_0 = arith.constant 0 : i32
    return %arg0, %c0_i32 : i32, i32
  }
  func.func @transform_1(%arg0: i32) -> (i32, i32) {
    %c1_i32 = arith.constant 1 : i32
    %0 = arith.addi %arg0, %c1_i32 : i32
    %c12_i32 = arith.constant 12 : i32
    %1 = arith.muli %0, %c12_i32 : i32
    %c0_i32 = arith.constant 0 : i32
    %c0_i32_0 = arith.constant 0 : i32
    return %1, %c0_i32 : i32, i32
  }
  func.func @transform_2(%arg0: i32) -> (i32, i32) {
    %c0_i32 = arith.constant 0 : i32
    %c0_i32_0 = arith.constant 0 : i32
    %c0_i32_1 = arith.constant 0 : i32
    return %c0_i32, %c0_i32_0 : i32, i32
  }
  func.func @transform_3(%arg0: i32) -> (i32, i32) {
    %c0_i32 = arith.constant 0 : i32
    %c0_i32_0 = arith.constant 0 : i32
    %c0_i32_1 = arith.constant 0 : i32
    return %c0_i32, %c0_i32_0 : i32, i32
  }
  func.func @transform_4(%arg0: i32) -> (i32, i32) {
    %c0_i32 = arith.constant 0 : i32
    %c0_i32_0 = arith.constant 0 : i32
    %c0_i32_1 = arith.constant 0 : i32
    return %c0_i32, %c0_i32_0 : i32, i32
  }
  func.func @transform_5(%arg0: i32) -> (i32, i32) {
    %c0_i32 = arith.constant 0 : i32
    %c0_i32_0 = arith.constant 0 : i32
    %c0_i32_1 = arith.constant 0 : i32
    return %c0_i32, %c0_i32_0 : i32, i32
  }
  func.func @transform_6(%arg0: i32) -> (i32, i32) {
    %c0_i32 = arith.constant 0 : i32
    %c0_i32_0 = arith.constant 0 : i32
    %c0_i32_1 = arith.constant 0 : i32
    return %c0_i32, %c0_i32_0 : i32, i32
  }
  func.func @transform_7(%arg0: i32) -> (i32, i32) {
    %c0_i32 = arith.constant 0 : i32
    %c0_i32_0 = arith.constant 0 : i32
    %c0_i32_1 = arith.constant 0 : i32
    return %c0_i32, %c0_i32_0 : i32, i32
  }
  func.func @transform_8(%arg0: i32) -> (i32, i32) {
    %c0_i32 = arith.constant 0 : i32
    %c0_i32_0 = arith.constant 0 : i32
    return %arg0, %c0_i32 : i32, i32
  }
  func.func @transform_9(%arg0: i32) -> (i32, i32) {
    %c0_i32 = arith.constant 0 : i32
    %c0_i32_0 = arith.constant 0 : i32
    return %arg0, %c0_i32 : i32, i32
  }
  func.func @transform_10(%arg0: i32) -> (i32, i32) {
    %c0_i32 = arith.constant 0 : i32
    %c0_i32_0 = arith.constant 0 : i32
    return %arg0, %c0_i32 : i32, i32
  }
}

</mosaic_0001>

<bundles_post_ra>
// kernel: cnn_model_forward.1
= control target key start
LH: loop header
LB: loop body
LE: loop exit
PB: predicated region body
PF: predicated region fallthrough
CT: control target
= control target key end

     0   :  { %vm104_vm0 = vsmask.f32 7424  ;;  %vm164_vm1 = vcmask 1046528   ;;  %vm184_vm2 = vsmask.f32 6400  ;;  %vm220_vm3 = vcmask 1045504   ;;  %s2980_s2 = inlined_call_operand.vmem [shape: bf16[384,128], index: 2, kind: input, shape index: {}]   ;;  %s2981_s0 = inlined_call_operand.vmem [shape: bf16[104,128], index: 0, kind: input, shape index: {}, may-alias: {0,1}]   ;;  %s2982_s3 = inlined_call_operand.vmem [shape: bf16[512,128], index: 3, kind: input, shape index: {}]   ;;  %s2983_s1 = inlined_call_operand.vmem [shape: bf16[104,128], index: 1, kind: input, shape index: {}, may-alias: {0,1}]   ;;  %s2984_s4 = inlined_call_operand.vmem [shape: bf16[640,128], index: 4, kind: input, shape index: {}]   ;;  %s2985_s5 = inlined_call_operand.vmem [shape: f32[1,128], index: 5, kind: input, shape index: {}]   ;;  %s2986_s8 = inlined_call_operand.vmem [shape: f32[96,128], index: 8, kind: output, shape index: {0}]   ;;  %s2987_s6 = inlined_call_operand.vmem [shape: f32[1,128], index: 6, kind: input, shape index: {}]   ;;  %s2988_s9 = inlined_call_operand.vmem [shape: f32[96,128], index: 9, kind: output, shape index: {1}]   ;;  %s2989_s7 = inlined_call_operand.vmem [shape: f32[1,128], index: 7, kind: input, shape index: {}]   ;;  %s2990_s10 = inlined_call_operand.vmem [shape: f32[96,128], index: 10, kind: output, shape index: {2}]  }
   0x1   :  { %v2136_v0 = vld [vmem:[%s2980_s2 + $0x40] sm:$0xff]   ;;  %v2139_v3 = vld [vmem:[%s2980_s2 + $0x48] sm:$0xff]   ;;  %v2142_v6 = vld [vmem:[%s2980_s2 + $0x50] sm:$0xff]  }
   0x2   :  { %v2137_v1 = vld [vmem:[%s2980_s2 + $0x80] sm:$0xff]   ;;  %1792 = vmatprep.subr.bf16.mxu0 %v2136_v0  ;;  %v2140_v4 = vld [vmem:[%s2980_s2 + $0x88] sm:$0xff]   ;;  %v2143_v7 = vld [vmem:[%s2980_s2 + $0x90] sm:$0xff]  }
   0x3   :  { %v2138_v2 = vld [vmem:[%s2980_s2] sm:$0xff]   ;;  %2080 = vmatprep.subr.bf16.mxu1 %v2137_v1  ;;  %v2141_v5 = vld [vmem:[%s2980_s2 + $0x8] sm:$0xff]   ;;  %v2144_v8 = vld [vmem:[%s2980_s2 + $0x10] sm:$0xff]  }
   0x4   :  { %1793 = vmatpush3.bf16.msra.mxu0 %v2138_v2  ;;  %2081 = vmatpush3.bf16.msra.mxu1 %v2137_v1  ;;  %v2145_v9 = vld [vmem:[%s2980_s2 + $0x58] sm:$0xff]   ;;  %v2148_v12 = vld [vmem:[%s2980_s2 + $0x60] sm:$0xff]   ;;  %v2151_v15 = vld [vmem:[%s2980_s2 + $0x68] sm:$0xff]  }
   0x5   :  { %1794 = vmatprep.subr.bf16.mxu0 %v2139_v3  ;;  %2082 = vmatprep.subr.bf16.mxu1 %v2140_v4  ;;  %v2146_v10 = vld [vmem:[%s2980_s2 + $0x98] sm:$0xff]   ;;  %v2149_v13 = vld [vmem:[%s2980_s2 + $0xa0] sm:$0xff]   ;;  %v2152_v16 = vld [vmem:[%s2980_s2 + $0xa8] sm:$0xff]  }
   0x6   :  { %v2147_v11 = vld [vmem:[%s2980_s2 + $0x18] sm:$0xff]   ;;  %v2150_v14 = vld [vmem:[%s2980_s2 + $0x20] sm:$0xff]   ;;  %v2153_v17 = vld [vmem:[%s2980_s2 + $0x28] sm:$0xff]  }
   0x7   :  { %v2154_v18 = vld [vmem:[%s2980_s2 + $0x70] sm:$0xff]   ;;  %v2157_v21 = vld [vmem:[%s2980_s2 + $0x78] sm:$0xff]   ;;  %v2365_v23 = vld [vmem:[%s2981_s0] sm:$0xff]  }
   0x8   :  { %1795 = vmatpush3.bf16.msra.mxu0 %v2141_v5  ;;  %2083 = vmatpush3.bf16.msra.mxu1 %v2140_v4  ;;  %v2155_v19 = vld [vmem:[%s2980_s2 + $0xb0] sm:$0xff]   ;;  %v2158_v22 = vld [vmem:[%s2980_s2 + $0xb8] sm:$0xff]   ;;  %v2370_v24 = vld [vmem:[%s2981_s0 + $0x8] sm:$0xff]   ;;  %v106_v26 = vshrl.u32 %v2365_v23, 16  ;;  %v108_v27 = vshll.u32 %v2365_v23, 16  ;;  %v165_v29 = vrot.slane %v2365_v23, 1 }
   0x9   :  { %1796 = vmatprep.subr.bf16.mxu0 %v2142_v6  ;;  %2084 = vmatprep.subr.bf16.mxu1 %v2143_v7  ;;  %v2156_v20 = vld [vmem:[%s2980_s2 + $0x30] sm:$0xff]   ;;  %v113_v28 = vshll.u32 %v2370_v24, 16  ;;  %v2159_v30 = vld [vmem:[%s2980_s2 + $0x38] sm:$0xff]   ;;  %v166_v31 = vrot.slane %v2370_v24, 1  ;;  %v2163_v33 = vld [vmem:[%s2982_s3 + $0x40] sm:$0xff]   ;;  %v117_v38 = vshrl.u32 %v2370_v24, 16 }
   0xa   :  { %v2375_v25 = vld [vmem:[%s2981_s0 + $0x10] sm:$0xff]   ;;  %v110_v34 = vrot.slane %v108_v27, 1  ;;  %v2164_v37 = vld [vmem:[%s2982_s3] sm:$0xff]   ;;  %v2165_v43 = vld [vmem:[%s2982_s3 + $0x48] sm:$0xff]  }
   0xb   :  { %v168_v32 = vrot.slane %v2375_v25, 1  ;;  %v115_v35 = vrot.slane %v113_v28, 1  ;;  %v2394_v36 = vsel %vm164_vm1, %v165_v29, %v166_v31  ;;  %v2166_v40 = vld [vmem:[%s2982_s3 + $0xc0] sm:$0xff]   ;;  %v121_v41 = vshll.u32 %v2375_v25, 16  ;;  %v2167_v48 = vld [vmem:[%s2982_s3 + $0x8] sm:$0xff]   ;;  %v2169_v50 = vld [vmem:[%s2982_s3 + $0x50] sm:$0xff]  }
   0xc   :  { %1797 = vmatpush3.bf16.msra.mxu0 %v2144_v8  ;;  %2085 = vmatpush3.bf16.msra.mxu1 %v2143_v7  ;;  %v111_v39 = vor.u32 %v110_v34, %v106_v26  ;;  %v2168_v46 = vld [vmem:[%s2982_s3 + $0x80] sm:$0xff]   ;;  %v2171_v51 = vld [vmem:[%s2982_s3 + $0xc8] sm:$0xff]   ;;  %v2170_v53 = vld [vmem:[%s2982_s3 + $0x10] sm:$0xff]   ;;  %v125_v54 = vshrl.u32 %v2375_v25, 16 }
   0xd   :  { %1798 = vmatprep.subr.bf16.mxu0 %v2145_v9  ;;  %2086 = vmatprep.subr.bf16.mxu1 %v2146_v10  ;;  %v2408_v42 = vsel %vm164_vm1, %v166_v31, %v168_v32  ;;  %v119_v44 = vor.u32 %v117_v38, %v115_v35  ;;  %v123_v47 = vrot.slane %v121_v41, 1  ;;  %v2172_v52 = vld [vmem:[%s2982_s3 + $0x88] sm:$0xff]   ;;  %v2449_v55 = vld [vmem:[%s2981_s0 + $0x18] sm:$0xff]   ;;  %v2458_v58 = vld [vmem:[%s2981_s0 + $0x20] sm:$0xff]  }
   0xe   :  { %2096 = vmatprep.mubr.bf16.mxu1 %v2394_v36  ;;  %v2416_v45 = vsel %vm104_vm0, %v111_v39, %v115_v35  ;;  %v2173_v56 = vld [vmem:[%s2982_s3 + $0x58] sm:$0xff]   ;;  %v170_v57 = vrot.slane %v2449_v55, 1  ;;  %v129_v61 = vshll.u32 %v2449_v55, 16  ;;  %v172_v63 = vrot.slane %v2458_v58, 1  ;;  %v2178_v0 = vld [vmem:[%s2982_s3 + $0xd0] sm:$0xff]   ;;  %v2177_v2 = vld [vmem:[%s2982_s3 + $0x60] sm:$0xff]  }
   0xf   :  { %471 = vmatprep.mubr.bf16.mxu0 %v2416_v45  ;;  %v2430_v49 = vsel %vm104_vm0, %v119_v44, %v123_v47  ;;  %v2175_v59 = vld [vmem:[%s2982_s3 + $0x18] sm:$0xff]   ;;  %v127_v60 = vor.u32 %v125_v54, %v123_v47  ;;  %v2180_v4 = vld [vmem:[%s2982_s3 + $0x90] sm:$0xff]   ;;  %v133_v5 = vshrl.u32 %v2449_v55, 16  ;;  %v2179_v7 = vld [vmem:[%s2982_s3 + $0x20] sm:$0xff]   ;;  %v137_v8 = vshll.u32 %v2458_v58, 16 }
  0x10   :  { %1799 = vmatpush3.bf16.msra.mxu0 %v2147_v11  ;;  %2087 = vmatpush3.bf16.msra.mxu1 %v2146_v10  ;;  %v2468_v62 = vsel %vm164_vm1, %v168_v32, %v170_v57  ;;  %v131_v1 = vrot.slane %v129_v61, 1  ;;  %v2481_v3 = vsel %vm164_vm1, %v170_v57, %v172_v63  ;;  %v2181_v9 = vld [vmem:[%s2982_s3 + $0x68] sm:$0xff]   ;;  %v2187_v31 = vld [vmem:[%s2982_s3 + $0x30] sm:$0xff]   ;;  %v2189_v34 = vld [vmem:[%s2982_s3 + $0xe0] sm:$0xff]   ;;  %v186_v57 = vrot.slane %v108_v27, 2 }
  0x11   :  { %1800 = vmatprep.subr.bf16.mxu0 %v2148_v12  ;;  %2088 = vmatprep.subr.bf16.mxu1 %v2149_v13  ;;  %v2502_v10 = vld [vmem:[%s2981_s0 + $0x28] sm:$0xff]   ;;  %v139_v12 = vrot.slane %v137_v8, 1  ;;  %v2188_v35 = vld [vmem:[%s2982_s3 + $0x78] sm:$0xff]   ;;  %v2191_v39 = vld [vmem:[%s2982_s3 + $0xa0] sm:$0xff]  }
  0x12   :  { %v2489_v6 = vsel %vm104_vm0, %v127_v60, %v131_v1  ;;  %v135_v11 = vor.u32 %v133_v5, %v131_v1  ;;  %v145_v29 = vshll.u32 %v2502_v10, 16  ;;  %v2194_v47 = vld [vmem:[%s2982_s3 + $0xe8] sm:$0xff]   ;;  %v2200_v27 = vld [vmem:[%s2982_s3 + $0xf8] sm:$0xff]  }
  0x13   :  { %v2202_v1 = vld [vmem:[%s2982_s3 + $0xb8] sm:$0xff]  }
  0x14   :  { %1801 = vmatpush3.bf16.msra.mxu0 %v2150_v14  ;;  %2089 = vmatpush3.bf16.msra.mxu1 %v2149_v13  ;;  %v141_v13 = vshrl.u32 %v2458_v58, 16  ;;  %v174_v14 = vrot.slane %v2502_v10, 1 }
  0x15   :  { %1802 = vmatprep.subr.bf16.mxu0 %v2151_v15  ;;  %2090 = vmatprep.subr.bf16.mxu1 %v2152_v16  ;;  %v2513_v15 = vld [vmem:[%s2983_s1 + $0x30] sm:$0xf] }
  0x16   :  { %v143_v32 = vor.u32 %v141_v13, %v139_v12 }
  0x18   :  { %1803 = vmatpush3.bf16.msra.mxu0 %v2153_v17  ;;  %2091 = vmatpush3.bf16.msra.mxu1 %v2152_v16  ;;  %v2184_v16 = vld [vmem:[%s2982_s3 + $0xd8] sm:$0xff]   ;;  %v176_v17 = vrot.slane %v2513_v15, 1 }
  0x19   :  { %1804 = vmatprep.subr.bf16.mxu0 %v2154_v18  ;;  %2092 = vmatprep.subr.bf16.mxu1 %v2155_v19  ;;  %v2520_v18 = vsel %vm104_vm0, %v135_v11, %v139_v12  ;;  %v192_v11 = vrot.slane %v125_v54, 1  ;;  %v2205_v54 = vld [vmem:[%s2984_s4 + $0x18] sm:$0xff]  }
  0x1c   :  { %1805 = vmatpush3.bf16.msra.mxu0 %v2156_v20  ;;  %2093 = vmatpush3.bf16.msra.mxu1 %v2155_v19  ;;  %v2185_v19 = vld [vmem:[%s2982_s3 + $0x98] sm:$0xff]   ;;  %v2527_v20 = vsel %vm164_vm1, %v172_v63, %v174_v14  ;;  %v2199_v63 = vld [vmem:[%s2982_s3 + $0xb0] sm:$0xff]  }
  0x1d   :  { %1806 = vmatprep.subr.bf16.mxu0 %v2157_v21  ;;  %2094 = vmatprep.subr.bf16.mxu1 %v2158_v22  ;;  %v2183_v21 = vld [vmem:[%s2982_s3 + $0x28] sm:$0xff]  }
  0x20   :  { %1807 = vmatpush3.bf16.msra.mxu0 %v2159_v30  ;;  %2095 = vmatpush3.bf16.msra.mxu1 %v2158_v22  ;;  %v2534_v22 = vsel %vm164_vm1, %v174_v14, %v176_v17  ;;  %v2186_v30 = vld [vmem:[%s2982_s3 + $0x70] sm:$0xff]   ;;  %v2206_v14 = vld [vmem:[%s2984_s4 + $0xc0] sm:$0xff]  }
  0x21   :  { %1858 = vmatprep.subr.bf16.mxu1 %v2163_v33  ;;  %1910 = vmatprep.subr.bf16.mxu0 %v2166_v40  ;;  %v147_v33 = vrot.slane %v145_v29, 1  ;;  %v153_v40 = vshll.u32 %v2513_v15, 16  ;;  %v2208_v17 = vld [vmem:[%s2984_s4 + $0x60] sm:$0xff]  }
  0x23   :  { %472 = vmatmul.mubr.bf16.vlgmr.msra.gmra.mrb[0].mxu0 %v2365_v23  ;;  %2097 = vmatmul.mubr.bf16.vlgmr.msra.gmra.mrb[0].mxu1 %v2408_v42  ;;  %v2565_v44 = vsel %vm104_vm0, %v143_v32, %v147_v33  ;;  %v197_v32 = vrot.slane %v129_v61, 2  ;;  %v2213_v61 = vld [vmem:[%s2984_s4 + $0x28] sm:$0xff]  }
  0x24   :  { %1859 = vmatpush3.bf16.msra.mxu1 %v2164_v37  ;;  %1911 = vmatpush3.bf16.msra.mxu0 %v2168_v46  ;;  %v149_v37 = vshrl.u32 %v2502_v10, 16  ;;  %v2192_v46 = vld [vmem:[%s2984_s4 + $0x40] sm:$0xff]  }
  0x25   :  { %1860 = vmatprep.subr.bf16.mxu1 %v2165_v43  ;;  %479 = vmatprep.mubr.bf16.mxu0 %v2430_v49  ;;  %v2190_v43 = vld [vmem:[%s2982_s3 + $0x38] sm:$0xff]  }
  0x26   :  { %1912 = vmatprep.subr.bf16.mxu0 %v2171_v51  ;;  %2100 = vmatprep.mubr.bf16.mxu1 %v2468_v62  ;;  %v155_v51 = vrot.slane %v153_v40, 1 }
  0x28   :  { %1861 = vmatpush3.bf16.msra.mxu1 %v2167_v48  ;;  %1913 = vmatpush3.bf16.msra.mxu0 %v2172_v52  ;;  %v2195_v48 = vld [vmem:[%s2982_s3 + $0xa8] sm:$0xff]   ;;  %v2193_v52 = vld [vmem:[%s2984_s4] sm:$0xff]  }
  0x29   :  { %1862 = vmatprep.subr.bf16.mxu1 %v2169_v50  ;;  %1914 = vmatprep.subr.bf16.mxu0 %v2178_v0  ;;  %v151_v50 = vor.u32 %v149_v37, %v147_v33  ;;  %v189_v0 = vrot.slane %v113_v28, 2  ;;  %v2201_v28 = vld [vmem:[%s2984_s4 + $0x50] sm:$0xff]  }
  0x2b   :  { %480 = vmatmul.mubr.bf16.gmra.mrb[4].mxu0 %v2370_v24  ;;  %2101 = vmatmul.mubr.bf16.gmra.mrb[4].mxu1 %v2481_v3  ;;  %v2596_v60 = vsel %vm104_vm0, %v151_v50, %v155_v51  ;;  %v2218_v51 = vld [vmem:[%s2984_s4 + $0xd8] sm:$0xff]  }
  0x2c   :  { %1863 = vmatpush3.bf16.msra.mxu1 %v2170_v53  ;;  %487 = vmatprep.mubr.bf16.mxu0 %v2489_v6  ;;  %v185_v53 = vrot.slane %v106_v26, 1  ;;  %v188_v26 = vrot.slane %v117_v38, 1  ;;  %v2197_v38 = vld [vmem:[%s2984_s4 + $0x8] sm:$0xff]  }
  0x2d   :  { %1864 = vmatprep.subr.bf16.mxu1 %v2173_v56  ;;  %1915 = vmatpush3.bf16.msra.mxu0 %v2180_v4  ;;  %v2198_v56 = vld [vmem:[%s2982_s3 + $0xf0] sm:$0xff]  }
  0x2e   :  { %1916 = vmatprep.subr.bf16.mxu0 %v2184_v16  ;;  %2104 = vmatprep.mubr.bf16.mxu1 %v2527_v20  ;;  %v190_v4 = vor.u32 %v189_v0, %v188_v26  ;;  %v193_v16 = vrot.slane %v121_v41, 2  ;;  %v204_v26 = vrot.slane %v149_v37, 1  ;;  %v2223_v0 = vld [vmem:[%s2984_s4 + $0xa0] sm:$0xff]  }
  0x30   :  { %1865 = vmatpush3.bf16.msra.mxu1 %v2175_v59  ;;  %v2196_v59 = vld [vmem:[%s2984_s4 + $0x48] sm:$0xff]   ;;  %v194_v41 = vor.u32 %v193_v16, %v192_v11  ;;  %v2230_v11 = vld [vmem:[%s2984_s4 + $0xf8] sm:$0xff]  }
  0x31   :  { %1866 = vmatprep.subr.bf16.mxu1 %v2177_v2  ;;  %1917 = vmatpush3.bf16.msra.mxu0 %v2185_v19  ;;  %v187_v2 = vor.u32 %v186_v57, %v185_v53  ;;  %v2207_v19 = vld [vmem:[%s2984_s4 + $0x80] sm:$0xff]   ;;  %v2220_v53 = vld [vmem:[%s2984_s4 + $0x78] sm:$0xff]   ;;  %v2227_v16 = vld [vmem:[%s2984_s4 + $0x108] sm:$0xff]  }
  0x32   :  { %1918 = vmatprep.subr.bf16.mxu0 %v2189_v34  ;;  %v2661_v33 = vsel %vm184_vm2, %v190_v4, %v194_v41  ;;  %v2212_v34 = vld [vmem:[%s2984_s4 + $0x68] sm:$0xff]   ;;  %v2222_v57 = vld [vmem:[%s2984_s4 + $0xe0] sm:$0xff]  }
  0x33   :  { %488 = vmatmul.mubr.bf16.gmra.mrb[8].mxu0 %v2375_v25  ;;  %2105 = vmatmul.mubr.bf16.gmra.mrb[8].mxu1 %v2534_v22  ;;  %v2630_v12 = vsel %vm184_vm2, %v187_v2, %v190_v4 }
  0x34   :  { %1867 = vmatpush3.bf16.msra.mxu1 %v2179_v7  ;;  %495 = vmatprep.mubr.bf16.mxu0 %v2520_v18  ;;  %v2203_v7 = vld [vmem:[%s2984_s4 + $0x10] sm:$0xff]  }
  0x35   :  { %1868 = vmatprep.subr.bf16.mxu1 %v2181_v9  ;;  %920 = vmatprep.mubr.bf16.mxu1 %v2416_v45  ;;  %v2204_v9 = vld [vmem:[%s2984_s4 + $0x58] sm:$0xff]  }
  0x36   :  { %1919 = vmatpush3.bf16.msra.mxu0 %v2191_v39  ;;  %v2214_v39 = vld [vmem:[%s2984_s4 + $0xd0] sm:$0xff]  }
  0x37   :  { %1920 = vmatprep.subr.bf16.mxu0 %v2194_v47  ;;  %v2217_v47 = vld [vmem:[%s2984_s4 + $0x30] sm:$0xff]  }
  0x38   :  { %1869 = vmatpush3.bf16.msra.mxu1 %v2183_v21  ;;  %v2209_v21 = vld [vmem:[%s2984_s4 + $0x20] sm:$0xff]  }
  0x39   :  { %1870 = vmatprep.subr.bf16.mxu1 %v2186_v30  ;;  %v196_v30 = vrot.slane %v133_v5, 1  ;;  %v2211_v5 = vld [vmem:[%s2984_s4 + $0x88] sm:$0xff]  }
  0x3a   :  { %1921 = vmatpush3.bf16.msra.mxu0 %v2195_v48  ;;  %v200_v48 = vrot.slane %v141_v13, 1  ;;  %v2219_v13 = vld [vmem:[%s2984_s4 + $0x98] sm:$0xff]  }
  0x3b   :  { %496 = vmatmul.mubr.bf16.gmra.mrb[12].mxu0 %v2449_v55  ;;  %1922 = vmatprep.subr.bf16.mxu0 %v2198_v56 }
  0x3c   :  { %1871 = vmatpush3.bf16.msra.mxu1 %v2187_v31  ;;  %503 = vmatprep.mubr.bf16.mxu0 %v2565_v44  ;;  %v2210_v31 = vld [vmem:[%s2984_s4 + $0xc8] sm:$0xff]  }
  0x3d   :  { %1872 = vmatprep.subr.bf16.mxu1 %v2188_v35  ;;  %v198_v35 = vor.u32 %v197_v32, %v196_v30 }
  0x3e   :  { %1923 = vmatpush3.bf16.msra.mxu0 %v2199_v63 }
  0x3f   :  { %1924 = vmatprep.subr.bf16.mxu0 %v2200_v27  ;;  %v2691_v50 = vsel %vm184_vm2, %v194_v41, %v198_v35  ;;  %v205_v27 = vrot.slane %v145_v29, 2  ;;  %v2226_v29 = vld [vmem:[%s2984_s4 + $0xa8] sm:$0xff]  }
  0x40   :  { %1873 = vmatpush3.bf16.msra.mxu1 %v2190_v43  ;;  %v2216_v43 = vld [vmem:[%s2984_s4 + $0x70] sm:$0xff]   ;;  %v2235_v41 = vld [vmem:[%s2984_s4 + $0x128] sm:$0xff]  }
  0x41   :  { %1962 = vmatprep.subr.bf16.mxu1 %v2192_v46  ;;  %v2215_v46 = vld [vmem:[%s2984_s4 + $0x90] sm:$0xff]   ;;  %v206_v37 = vor.u32 %v205_v27, %v204_v26 }
  0x42   :  { %1925 = vmatpush3.bf16.msra.mxu0 %v2202_v1  ;;  %v2228_v1 = vld [vmem:[%s2984_s4 + $0xf0] sm:$0xff]  }
  0x43   :  { %504 = vmatmul.mubr.bf16.gmra.mrb[16].mxu0 %v2458_v58  ;;  %921 = vmatmul.mubr.bf16.vlgmr.msra.gmra.mrb[12].mxu1 %v2365_v23 }
  0x44   :  { %1963 = vmatpush3.bf16.msra.mxu1 %v2193_v52  ;;  %511 = vmatprep.mubr.bf16.mxu0 %v2596_v60  ;;  %v201_v52 = vrot.slane %v137_v8, 2  ;;  %v2221_v8 = vld [vmem:[%s2984_s4 + $0x38] sm:$0xff]  }
  0x45   :  { %1964 = vmatprep.subr.bf16.mxu1 %v2196_v59  ;;  %928 = vmatprep.mubr.bf16.mxu1 %v2430_v49  ;;  %v2224_v59 = vld [vmem:[%s2984_s4 + $0x100] sm:$0xff]  }
  0x46   :  { %2014 = vmatprep.subr.bf16.mxu0 %v2206_v14  ;;  %v202_v56 = vor.u32 %v201_v52, %v200_v48 }
  0x48   :  { %1965 = vmatpush3.bf16.msra.mxu1 %v2197_v38  ;;  %v2720_v63 = vsel %vm184_vm2, %v198_v35, %v202_v56  ;;  %v2225_v38 = vld [vmem:[%s2984_s4 + $0xe8] sm:$0xff]   ;;  %v2742_v2 = vsel %vm184_vm2, %v202_v56, %v206_v37 }
  0x49   :  { %1966 = vmatprep.subr.bf16.mxu1 %v2201_v28  ;;  %v208_v28 = vshrl.u32 %v2513_v15, 16 }
  0x4b   :  { %512 = vmatmul.mubr.bf16.gmra.mrb[20].mxu0 %v2502_v10  ;;  %929 = vmatmul.mubr.bf16.gmra.mrb[16].mxu1 %v2370_v24  ;;  %v210_v4 = vrot.slane %v208_v28, 1 }
  0x4c   :  { %1967 = vmatpush3.bf16.msra.mxu1 %v2203_v7  ;;  %936 = vmatprep.mubr.bf16.mxu1 %v2489_v6  ;;  %v211_v7 = vrot.slane %v153_v40, 2  ;;  %v2232_v40 = vld [vmem:[%s2984_s4 + $0xb8] sm:$0xff]  }
  0x4d   :  { %1001 = vmatprep.mubr.bf16.mxu0 %v2630_v12  ;;  %1968 = vmatprep.subr.bf16.mxu1 %v2204_v9  ;;  %v2229_v9 = vld [vmem:[%s2984_s4 + $0xb0] sm:$0xff]  }
  0x4e   :  { %v212_v14 = vor.u32 %v211_v7, %v210_v4 }
  0x50   :  { %1969 = vmatpush3.bf16.msra.mxu1 %v2205_v54  ;;  %v213_v54 = vsel %vm184_vm2, %v206_v37, %v212_v14 }
  0x51   :  { %1970 = vmatprep.subr.bf16.mxu1 %v2208_v17  ;;  %v2233_v17 = vld [vmem:[%s2984_s4 + $0x118] sm:$0xff]  }
  0x53   :  { %937 = vmatmul.mubr.bf16.gmra.mrb[20].mxu1 %v2375_v25  ;;  %1002 = vmatmul.mubr.bf16.vlgmr.msra.gmra.mrb[24].mxu0 %v2394_v36 }
  0x54   :  { %2015 = vmatpush3.bf16.msra.mxu0 %v2207_v19  ;;  %944 = vmatprep.mubr.bf16.mxu1 %v2520_v18 }
  0x55   :  { %1009 = vmatprep.mubr.bf16.mxu0 %v2661_v33  ;;  %1971 = vmatpush3.bf16.msra.mxu1 %v2209_v21 }
  0x56   :  { %2016 = vmatprep.subr.bf16.mxu0 %v2210_v31  ;;  %1972 = vmatprep.subr.bf16.mxu1 %v2212_v34 }
  0x58   :  { %2017 = vmatpush3.bf16.msra.mxu0 %v2211_v5 }
  0x59   :  { %1973 = vmatpush3.bf16.msra.mxu1 %v2213_v61  ;;  %2018 = vmatprep.subr.bf16.mxu0 %v2214_v39 }
  0x5a   :  { %1974 = vmatprep.subr.bf16.mxu1 %v2216_v43 }
  0x5b   :  { %945 = vmatmul.mubr.bf16.gmra.mrb[24].mxu1 %v2449_v55  ;;  %1010 = vmatmul.mubr.bf16.gmra.mrb[28].mxu0 %v2408_v42 }
  0x5c   :  { %952 = vmatprep.mubr.bf16.mxu1 %v2565_v44  ;;  %1017 = vmatprep.mubr.bf16.mxu0 %v2691_v50 }
  0x5d   :  { %2019 = vmatpush3.bf16.msra.mxu0 %v2215_v46  ;;  %1975 = vmatpush3.bf16.msra.mxu1 %v2217_v47 }
  0x5e   :  { %2020 = vmatprep.subr.bf16.mxu0 %v2218_v51  ;;  %1976 = vmatprep.subr.bf16.mxu1 %v2220_v53 }
  0x61   :  { %2021 = vmatpush3.bf16.msra.mxu0 %v2219_v13  ;;  %1977 = vmatpush3.bf16.msra.mxu1 %v2221_v8 }
  0x62   :  { %2022 = vmatprep.subr.bf16.mxu0 %v2222_v57  ;;  %2108 = vmatprep.subr.bf16.mxu1 %v2224_v59 }
  0x63   :  { %953 = vmatmul.mubr.bf16.gmra.mrb[28].mxu1 %v2458_v58  ;;  %1018 = vmatmul.mubr.bf16.gmra.mrb[32].mxu0 %v2468_v62 }
  0x64   :  { %960 = vmatprep.mubr.bf16.mxu1 %v2596_v60  ;;  %1025 = vmatprep.mubr.bf16.mxu0 %v2720_v63 }
  0x65   :  { %2023 = vmatpush3.bf16.msra.mxu0 %v2223_v0 }
  0x66   :  { %2024 = vmatprep.subr.bf16.mxu0 %v2225_v38 }
  0x69   :  { %2025 = vmatpush3.bf16.msra.mxu0 %v2226_v29 }
  0x6a   :  { %2026 = vmatprep.subr.bf16.mxu0 %v2228_v1 }
  0x6b   :  { %961 = vmatmul.mubr.bf16.gmra.mrb[32].mxu1 %v2502_v10  ;;  %1026 = vmatmul.mubr.bf16.gmra.mrb[36].mxu0 %v2481_v3 }
  0x6c   :  { %1033 = vmatprep.mubr.bf16.mxu0 %v2742_v2  ;;  %1433 = vmatprep.mubr.bf16.mxu1 %v2416_v45  ;;  %v2231_v45 = vld [vmem:[%s2984_s4 + $0x110] sm:$0xff]  }
  0x6d   :  { %2027 = vmatpush3.bf16.msra.mxu0 %v2229_v9 }
  0x6e   :  { %2028 = vmatprep.subr.bf16.mxu0 %v2230_v11 }
  0x71   :  { %2029 = vmatpush3.bf16.msra.mxu0 %v2232_v40 }
  0x73   :  { %1034 = vmatmul.mubr.bf16.gmra.mrb[40].mxu0 %v2527_v20  ;;  %1434 = vmatmul.mubr.bf16.vlgmr.msra.gmra.mrb[36].mxu1 %v2365_v23 }
  0x74   :  { %2109 = vmatpush3.bf16.msra.mxu1 %v2224_v59  ;;  %1041 = vmatprep.mubr.bf16.mxu0 %v213_v54 }
  0x75   :  { %2110 = vmatprep.subr.bf16.mxu1 %v2227_v16  ;;  %1441 = vmatprep.mubr.bf16.mxu1 %v2430_v49  ;;  %v2234_v49 = vld [vmem:[%s2984_s4 + $0x120] sm:$0xff]  }
  0x78   :  { %2111 = vmatpush3.bf16.msra.mxu1 %v2227_v16 }
  0x79   :  { %2112 = vmatprep.subr.bf16.mxu1 %v2231_v45 }
  0x7b   :  { %1042 = vmatmul.mubr.bf16.gmra.mrb[44].mxu0 %v2534_v22  ;;  %1442 = vmatmul.mubr.bf16.gmra.mrb[40].mxu1 %v2370_v24 }
  0x7c   :  { %2113 = vmatpush3.bf16.msra.mxu1 %v2231_v45  ;;  %1449 = vmatprep.mubr.bf16.mxu1 %v2489_v6  ;;  %v2236_v6 = vld [vmem:[%s2984_s4 + $0x130] sm:$0xff]  }
  0x7d   :  { %1514 = vmatprep.mubr.bf16.mxu0 %v2630_v12  ;;  %2114 = vmatprep.subr.bf16.mxu1 %v2233_v17  ;;  %v2237_v12 = vld [vmem:[%s2984_s4 + $0x138] sm:$0xff]  }
  0x80   :  { %2115 = vmatpush3.bf16.msra.mxu1 %v2233_v17 }
  0x81   :  { %2116 = vmatprep.subr.bf16.mxu1 %v2234_v49 }
  0x83   :  { %1450 = vmatmul.mubr.bf16.gmra.mrb[44].mxu1 %v2375_v25  ;;  %1515 = vmatmul.mubr.bf16.vlgmr.msra.gmra.mrb[48].mxu0 %v2394_v36  ;;  %v221_v36 = vrot.slane %v2365_v23, 2 }
  0x84   :  { %1457 = vmatprep.mubr.bf16.mxu1 %v2520_v18  ;;  %1522 = vmatprep.mubr.bf16.mxu0 %v2661_v33  ;;  %v222_v18 = vrot.slane %v2370_v24, 2  ;;  %v228_v24 = vrot.slane %v2458_v58, 2 }
  0x85   :  { %2117 = vmatpush3.bf16.msra.mxu1 %v2234_v49 }
  0x86   :  { %2118 = vmatprep.subr.bf16.mxu1 %v2235_v41 }
  0x89   :  { %2119 = vmatpush3.bf16.msra.mxu1 %v2235_v41 }
  0x8a   :  { %2120 = vmatprep.subr.bf16.mxu1 %v2236_v6 }
  0x8b   :  { %1458 = vmatmul.mubr.bf16.gmra.mrb[48].mxu1 %v2449_v55  ;;  %1523 = vmatmul.mubr.bf16.gmra.mrb[52].mxu0 %v2408_v42  ;;  %v223_v42 = vsel %vm220_vm3, %v221_v36, %v222_v18 }
  0x8c   :  { %1465 = vmatprep.mubr.bf16.mxu1 %v2565_v44  ;;  %1530 = vmatprep.mubr.bf16.mxu0 %v2691_v50  ;;  %v226_v44 = vrot.slane %v2449_v55, 2 }
  0x8d   :  { %2121 = vmatpush3.bf16.msra.mxu1 %v2236_v6 }
  0x8e   :  { %2122 = vmatprep.subr.bf16.mxu1 %v2237_v12  ;;  %v229_v19 = vsel %vm220_vm3, %v226_v44, %v228_v24 }
  0x91   :  { %2123 = vmatpush3.bf16.msra.mxu1 %v2237_v12 }
  0x93   :  { %1466 = vmatmul.mubr.bf16.gmra.mrb[52].mxu1 %v2458_v58  ;;  %1531 = vmatmul.mubr.bf16.gmra.mrb[56].mxu0 %v2468_v62  ;;  %v224_v62 = vrot.slane %v2375_v25, 2  ;;  %v232_v25 = vrot.slane %v2513_v15, 2  ;;  %v2821_v58 = vld [vmem:[%s2985_s5] ss:$0 sm:$0xff] }
  0x94   :  { %1473 = vmatprep.mubr.bf16.mxu1 %v2596_v60  ;;  %1538 = vmatprep.mubr.bf16.mxu0 %v2720_v63 }
  0x95   :  { %v225_v60 = vsel %vm220_vm3, %v222_v18, %v224_v62  ;;  %v227_v23 = vsel %vm220_vm3, %v224_v62, %v226_v44 }
  0x9b   :  { %1474 = vmatmul.mubr.bf16.gmra.mrb[56].mxu1 %v2502_v10  ;;  %1539 = vmatmul.mubr.bf16.gmra.mrb[60].mxu0 %v2481_v3  ;;  %v230_v3 = vrot.slane %v2502_v10, 2 }
  0x9c   :  { %1546 = vmatprep.mubr.bf16.mxu0 %v2742_v2  ;;  %2124 = vmatprep.mubr.bf16.mxu1 %v223_v42 }
  0x9d   :  { %v231_v21 = vsel %vm220_vm3, %v228_v24, %v230_v3  ;;  %v233_v55 = vsel %vm220_vm3, %v230_v3, %v232_v25 }
  0xa3   :  { %1547 = vmatmul.mubr.bf16.gmra.mrb[64].mxu0 %v2527_v20  ;;  %2125 = vmatmul.mubr.bf16.vlgmr.msra.gmra.mrb[60].mxu1 %v225_v60 }
  0xa4   :  { %1554 = vmatprep.mubr.bf16.mxu0 %v213_v54  ;;  %2128 = vmatprep.mubr.bf16.mxu1 %v227_v23 }
  0xab   :  { %1555 = vmatmul.mubr.bf16.gmra.mrb[68].mxu0 %v2534_v22  ;;  %2129 = vmatmul.mubr.bf16.gmra.mrb[64].mxu1 %v229_v19 }
  0xac   :  { %2132 = vmatprep.mubr.bf16.mxu1 %v231_v21 }
  0xb3   :  { %2133 = vmatmul.mubr.bf16.gmra.mrb[68].mxu1 %v233_v55 }
  0xf6   :  { %v1808_v20 = vpop.f32.mrb[0].mxu0  ;;  %v2098_v30 = vpop.f32.mrb[0].mxu1 }
  0xf7   :  { %v1809_v31 = vpop.f32.mrb[1].mxu0  ;;  %v554_v10 = vpop.f32.mrb[1].mxu1 }
  0xf8   :  { %v1810_v32 = vadd.f32 %v1809_v31, %v1808_v20  ;;  %v1811_v33 = vpop.f32.mrb[2].mxu0  ;;  %v2099_v34 = vpop.f32.mrb[2].mxu1 }
  0xf9   :  { %v1812_v22 = vpop.f32.mrb[3].mxu0  ;;  %v557_v5 = vpop.f32.mrb[3].mxu1 }
  0xfa   :  { %v474_v61 = vadd.f32 %v1810_v32, %v2821_v58  ;;  %v1813_v15 = vadd.f32 %v1812_v22, %v1811_v33 }
  0xfc   :  { %v555_v35 = vadd.f32 %v554_v10, %v474_v61  ;;  %v477_v39 = vadd.f32 %v1813_v15, %v2821_v58 }
  0xfe   :  { %v601_v43 = vmax.f32 %v555_v35, 0.0  ;;  %v558_v46 = vadd.f32 %v557_v5, %v477_v39  ;;  %v1814_v47 = vpop.f32.mrb[4].mxu0  ;;  %v2102_v13 = vpop.f32.mrb[4].mxu1 }
  0xff   :  { %v1815_v48 = vpop.f32.mrb[5].mxu0  ;;  %v570_v57 = vpop.f32.mrb[5].mxu1 }
 0x100   :  { %613 = vst [vmem:[%s2986_s8] sm:$0xff] %v601_v43  ;;  %v602_v50 = vmax.f32 %v558_v46, 0.0  ;;  %v1816_v51 = vadd.f32 %v1815_v48, %v1814_v47  ;;  %v1817_v52 = vpop.f32.mrb[6].mxu0  ;;  %v2103_v59 = vpop.f32.mrb[6].mxu1 }
 0x101   :  { %v1818_v53 = vpop.f32.mrb[7].mxu0  ;;  %v573_v0 = vpop.f32.mrb[7].mxu1 }
 0x102   :  { %614 = vst [vmem:[%s2986_s8 + $0x8] sm:$0xff] %v602_v50  ;;  %v482_v8 = vadd.f32 %v1816_v51, %v2821_v58  ;;  %v1819_v56 = vadd.f32 %v1818_v53, %v1817_v52 }
 0x104   :  { %v563_v26 = vadd.f32 %v2098_v30, %v482_v8  ;;  %v485_v63 = vadd.f32 %v1819_v56, %v2821_v58 }
 0x106   :  { %v603_v27 = vmax.f32 %v563_v26, 0.0  ;;  %v566_v38 = vadd.f32 %v2099_v34, %v485_v63  ;;  %v1820_v37 = vpop.f32.mrb[8].mxu0  ;;  %v2106_v7 = vpop.f32.mrb[8].mxu1 }
 0x107   :  { %v1821_v29 = vpop.f32.mrb[9].mxu0  ;;  %v586_v14 = vpop.f32.mrb[9].mxu1 }
 0x108   :  { %615 = vst [vmem:[%s2986_s8 + $0x10] sm:$0xff] %v603_v27  ;;  %v604_v28 = vmax.f32 %v566_v38, 0.0  ;;  %v1822_v1 = vadd.f32 %v1821_v29, %v1820_v37  ;;  %v1823_v2 = vpop.f32.mrb[10].mxu0  ;;  %v2107_v40 = vpop.f32.mrb[10].mxu1  ;;  %v2868_v38 = vld [vmem:[%s2987_s6] ss:$0 sm:$0xff] }
 0x109   :  { %v1824_v4 = vpop.f32.mrb[11].mxu0  ;;  %v589_v45 = vpop.f32.mrb[11].mxu1 }
 0x10a   :  { %616 = vst [vmem:[%s2986_s8 + $0x18] sm:$0xff] %v604_v28  ;;  %v490_v9 = vadd.f32 %v1822_v1, %v2821_v58  ;;  %v1825_v11 = vadd.f32 %v1824_v4, %v1823_v2 }
 0x10c   :  { %v571_v16 = vadd.f32 %v570_v57, %v490_v9  ;;  %v493_v54 = vadd.f32 %v1825_v11, %v2821_v58 }
 0x10e   :  { %v605_v17 = vmax.f32 %v571_v16, 0.0  ;;  %v574_v49 = vadd.f32 %v573_v0, %v493_v54  ;;  %v1826_v41 = vpop.f32.mrb[12].mxu0 }
 0x10f   :  { %v1827_v6 = vpop.f32.mrb[13].mxu0 }
 0x110   :  { %617 = vst [vmem:[%s2986_s8 + $0x20] sm:$0xff] %v605_v17  ;;  %v606_v12 = vmax.f32 %v574_v49, 0.0  ;;  %v1828_v36 = vadd.f32 %v1827_v6, %v1826_v41  ;;  %v1829_v18 = vpop.f32.mrb[14].mxu0 }
 0x111   :  { %v1830_v42 = vpop.f32.mrb[15].mxu0 }
 0x112   :  { %618 = vst [vmem:[%s2986_s8 + $0x28] sm:$0xff] %v606_v12  ;;  %v498_v62 = vadd.f32 %v1828_v36, %v2821_v58  ;;  %v1831_v44 = vadd.f32 %v1830_v42, %v1829_v18 }
 0x114   :  { %v579_v60 = vadd.f32 %v2102_v13, %v498_v62  ;;  %v501_v23 = vadd.f32 %v1831_v44, %v2821_v58 }
 0x116   :  { %v607_v24 = vmax.f32 %v579_v60, 0.0  ;;  %v582_v3 = vadd.f32 %v2103_v59, %v501_v23  ;;  %v1832_v19 = vpop.f32.mrb[16].mxu0  ;;  %v1874_v21 = vpop.f32.mrb[12].mxu1 }
 0x117   :  { %v1833_v25 = vpop.f32.mrb[17].mxu0  ;;  %v1875_v55 = vpop.f32.mrb[13].mxu1 }
 0x118   :  { %619 = vst [vmem:[%s2986_s8 + $0x30] sm:$0xff] %v607_v24  ;;  %v608_v20 = vmax.f32 %v582_v3, 0.0  ;;  %v1834_v30 = vadd.f32 %v1833_v25, %v1832_v19  ;;  %v1876_v31 = vadd.f32 %v1875_v55, %v1874_v21  ;;  %v1835_v10 = vpop.f32.mrb[18].mxu0  ;;  %v1877_v32 = vpop.f32.mrb[14].mxu1 }
 0x119   :  { %v1836_v33 = vpop.f32.mrb[19].mxu0  ;;  %v1878_v34 = vpop.f32.mrb[15].mxu1 }
 0x11a   :  { %620 = vst [vmem:[%s2986_s8 + $0x38] sm:$0xff] %v608_v20  ;;  %v506_v22 = vadd.f32 %v1834_v30, %v2821_v58  ;;  %v1837_v5 = vadd.f32 %v1836_v33, %v1835_v10  ;;  %v1879_v61 = vadd.f32 %v1878_v34, %v1877_v32  ;;  %v923_v9 = vadd.f32 %v1876_v31, %v2868_v38 }
 0x11c   :  { %v587_v15 = vadd.f32 %v586_v14, %v506_v22  ;;  %v509_v35 = vadd.f32 %v1837_v5, %v2821_v58  ;;  %v926_v17 = vadd.f32 %v1879_v61, %v2868_v38 }
 0x11e   :  { %v609_v39 = vmax.f32 %v587_v15, 0.0  ;;  %v590_v43 = vadd.f32 %v589_v45, %v509_v35  ;;  %v1838_v46 = vpop.f32.mrb[20].mxu0  ;;  %v1880_v47 = vpop.f32.mrb[16].mxu1 }
 0x11f   :  { %v1839_v48 = vpop.f32.mrb[21].mxu0  ;;  %v1881_v50 = vpop.f32.mrb[17].mxu1 }
 0x120   :  { %621 = vst [vmem:[%s2986_s8 + $0x40] sm:$0xff] %v609_v39  ;;  %v610_v51 = vmax.f32 %v590_v43, 0.0  ;;  %v1840_v52 = vadd.f32 %v1839_v48, %v1838_v46  ;;  %v1882_v53 = vadd.f32 %v1881_v50, %v1880_v47  ;;  %v1841_v13 = vpop.f32.mrb[22].mxu0  ;;  %v1883_v8 = vpop.f32.mrb[18].mxu1 }
 0x121   :  { %v1842_v56 = vpop.f32.mrb[23].mxu0  ;;  %v1884_v57 = vpop.f32.mrb[19].mxu1 }
 0x122   :  { %622 = vst [vmem:[%s2986_s8 + $0x48] sm:$0xff] %v610_v51  ;;  %v514_v59 = vadd.f32 %v1840_v52, %v2821_v58  ;;  %v1843_v26 = vadd.f32 %v1842_v56, %v1841_v13  ;;  %v1885_v63 = vadd.f32 %v1884_v57, %v1883_v8  ;;  %v931_v60 = vadd.f32 %v1882_v53, %v2868_v38 }
 0x124   :  { %v595_v0 = vadd.f32 %v2106_v7, %v514_v59  ;;  %v517_v27 = vadd.f32 %v1843_v26, %v2821_v58  ;;  %v934_v55 = vadd.f32 %v1885_v63, %v2868_v38 }
 0x126   :  { %v611_v37 = vmax.f32 %v595_v0, 0.0  ;;  %v598_v29 = vadd.f32 %v2107_v40, %v517_v27  ;;  %v1886_v28 = vpop.f32.mrb[20].mxu1  ;;  %v1926_v1 = vpop.f32.mrb[24].mxu0 }
 0x127   :  { %v1887_v2 = vpop.f32.mrb[21].mxu1  ;;  %v1927_v4 = vpop.f32.mrb[25].mxu0 }
 0x128   :  { %623 = vst [vmem:[%s2986_s8 + $0x50] sm:$0xff] %v611_v37  ;;  %v612_v7 = vmax.f32 %v598_v29, 0.0  ;;  %v1888_v11 = vadd.f32 %v1887_v2, %v1886_v28  ;;  %v1928_v58 = vadd.f32 %v1927_v4, %v1926_v1  ;;  %v1889_v14 = vpop.f32.mrb[22].mxu1  ;;  %v1929_v16 = vpop.f32.mrb[26].mxu0 }
 0x129   :  { %v1890_v54 = vpop.f32.mrb[23].mxu1  ;;  %v1930_v45 = vpop.f32.mrb[27].mxu0 }
 0x12a   :  { %624 = vst [vmem:[%s2986_s8 + $0x58] sm:$0xff] %v612_v7  ;;  %v1004_v40 = vadd.f32 %v1928_v58, %v923_v9  ;;  %v1891_v49 = vadd.f32 %v1890_v54, %v1889_v14  ;;  %v1931_v41 = vadd.f32 %v1930_v45, %v1929_v16  ;;  %v939_v15 = vadd.f32 %v1888_v11, %v2868_v38 }
 0x12c   :  { %v1050_v6 = vmax.f32 %v1004_v40, 0.0  ;;  %v1007_v12 = vadd.f32 %v1931_v41, %v926_v17  ;;  %v942_v50 = vadd.f32 %v1891_v49, %v2868_v38 }
 0x12e   :  { %1062 = vst [vmem:[%s2988_s9] sm:$0xff] %v1050_v6  ;;  %v1051_v36 = vmax.f32 %v1007_v12, 0.0  ;;  %v1892_v18 = vpop.f32.mrb[24].mxu1  ;;  %v1932_v42 = vpop.f32.mrb[28].mxu0 }
 0x12f   :  { %v1893_v62 = vpop.f32.mrb[25].mxu1  ;;  %v1933_v44 = vpop.f32.mrb[29].mxu0 }
 0x130   :  { %1063 = vst [vmem:[%s2988_s9 + $0x8] sm:$0xff] %v1051_v36  ;;  %v1894_v23 = vadd.f32 %v1893_v62, %v1892_v18  ;;  %v1934_v24 = vadd.f32 %v1933_v44, %v1932_v42  ;;  %v1895_v3 = vpop.f32.mrb[26].mxu1  ;;  %v1935_v19 = vpop.f32.mrb[30].mxu0 }
 0x131   :  { %v1896_v21 = vpop.f32.mrb[27].mxu1  ;;  %v1936_v25 = vpop.f32.mrb[31].mxu0 }
 0x132   :  { %v1012_v20 = vadd.f32 %v1934_v24, %v931_v60  ;;  %v1897_v30 = vadd.f32 %v1896_v21, %v1895_v3  ;;  %v1937_v31 = vadd.f32 %v1936_v25, %v1935_v19  ;;  %v947_v0 = vadd.f32 %v1894_v23, %v2868_v38 }
 0x134   :  { %v1052_v10 = vmax.f32 %v1012_v20, 0.0  ;;  %v1015_v32 = vadd.f32 %v1937_v31, %v934_v55  ;;  %v950_v4 = vadd.f32 %v1897_v30, %v2868_v38 }
 0x136   :  { %1064 = vst [vmem:[%s2988_s9 + $0x10] sm:$0xff] %v1052_v10  ;;  %v1053_v33 = vmax.f32 %v1015_v32, 0.0  ;;  %v1898_v34 = vpop.f32.mrb[28].mxu1  ;;  %v1938_v22 = vpop.f32.mrb[32].mxu0 }
 0x137   :  { %v1899_v5 = vpop.f32.mrb[29].mxu1  ;;  %v1939_v61 = vpop.f32.mrb[33].mxu0 }
 0x138   :  { %1065 = vst [vmem:[%s2988_s9 + $0x18] sm:$0xff] %v1053_v33  ;;  %v1900_v35 = vadd.f32 %v1899_v5, %v1898_v34  ;;  %v1940_v39 = vadd.f32 %v1939_v61, %v1938_v22  ;;  %v1901_v43 = vpop.f32.mrb[30].mxu1  ;;  %v1941_v46 = vpop.f32.mrb[34].mxu0 }
 0x139   :  { %v1902_v47 = vpop.f32.mrb[31].mxu1  ;;  %v1942_v48 = vpop.f32.mrb[35].mxu0 }
 0x13a   :  { %v1020_v51 = vadd.f32 %v1940_v39, %v939_v15  ;;  %v1903_v52 = vadd.f32 %v1902_v47, %v1901_v43  ;;  %v1943_v53 = vadd.f32 %v1942_v48, %v1941_v46  ;;  %v955_v49 = vadd.f32 %v1900_v35, %v2868_v38  ;;  %v2921_v46 = vld [vmem:[%s2989_s7] ss:$0 sm:$0xff] }
 0x13c   :  { %v1054_v13 = vmax.f32 %v1020_v51, 0.0  ;;  %v1023_v8 = vadd.f32 %v1943_v53, %v942_v50  ;;  %v958_v62 = vadd.f32 %v1903_v52, %v2868_v38 }
 0x13e   :  { %1066 = vst [vmem:[%s2988_s9 + $0x20] sm:$0xff] %v1054_v13  ;;  %v1055_v56 = vmax.f32 %v1023_v8, 0.0  ;;  %v1904_v57 = vpop.f32.mrb[32].mxu1  ;;  %v1944_v59 = vpop.f32.mrb[36].mxu0 }
 0x13f   :  { %v1905_v26 = vpop.f32.mrb[33].mxu1  ;;  %v1945_v63 = vpop.f32.mrb[37].mxu0 }
 0x140   :  { %1067 = vst [vmem:[%s2988_s9 + $0x28] sm:$0xff] %v1055_v56  ;;  %v1906_v27 = vadd.f32 %v1905_v26, %v1904_v57  ;;  %v1946_v37 = vadd.f32 %v1945_v63, %v1944_v59  ;;  %v1907_v29 = vpop.f32.mrb[34].mxu1  ;;  %v1947_v28 = vpop.f32.mrb[38].mxu0 }
 0x141   :  { %v1908_v1 = vpop.f32.mrb[35].mxu1  ;;  %v1948_v2 = vpop.f32.mrb[39].mxu0 }
 0x142   :  { %v1028_v9 = vadd.f32 %v1946_v37, %v947_v0  ;;  %v1909_v7 = vadd.f32 %v1908_v1, %v1907_v29  ;;  %v1949_v11 = vadd.f32 %v1948_v2, %v1947_v28  ;;  %v963_v30 = vadd.f32 %v1906_v27, %v2868_v38 }
 0x144   :  { %v1056_v58 = vmax.f32 %v1028_v9, 0.0  ;;  %v1031_v14 = vadd.f32 %v1949_v11, %v950_v4  ;;  %v966_v5 = vadd.f32 %v1909_v7, %v2868_v38 }
 0x146   :  { %1068 = vst [vmem:[%s2988_s9 + $0x30] sm:$0xff] %v1056_v58  ;;  %v1057_v16 = vmax.f32 %v1031_v14, 0.0  ;;  %v1950_v54 = vpop.f32.mrb[40].mxu0  ;;  %v1978_v45 = vpop.f32.mrb[36].mxu1 }
 0x147   :  { %v1951_v17 = vpop.f32.mrb[41].mxu0  ;;  %v1979_v40 = vpop.f32.mrb[37].mxu1 }
 0x148   :  { %1069 = vst [vmem:[%s2988_s9 + $0x38] sm:$0xff] %v1057_v16  ;;  %v1952_v41 = vadd.f32 %v1951_v17, %v1950_v54  ;;  %v1980_v6 = vadd.f32 %v1979_v40, %v1978_v45  ;;  %v1953_v12 = vpop.f32.mrb[42].mxu0  ;;  %v1981_v36 = vpop.f32.mrb[38].mxu1 }
 0x149   :  { %v1954_v18 = vpop.f32.mrb[43].mxu0  ;;  %v1982_v42 = vpop.f32.mrb[39].mxu1 }
 0x14a   :  { %v1036_v44 = vadd.f32 %v1952_v41, %v955_v49  ;;  %v1955_v60 = vadd.f32 %v1954_v18, %v1953_v12  ;;  %v1983_v23 = vadd.f32 %v1982_v42, %v1981_v36  ;;  %v1436_v38 = vadd.f32 %v1980_v6, %v2921_v46 }
 0x14c   :  { %v1058_v24 = vmax.f32 %v1036_v44, 0.0  ;;  %v1039_v3 = vadd.f32 %v1955_v60, %v958_v62  ;;  %v1439_v26 = vadd.f32 %v1983_v23, %v2921_v46 }
 0x14e   :  { %1070 = vst [vmem:[%s2988_s9 + $0x40] sm:$0xff] %v1058_v24  ;;  %v1059_v19 = vmax.f32 %v1039_v3, 0.0  ;;  %v1956_v21 = vpop.f32.mrb[44].mxu0  ;;  %v1984_v25 = vpop.f32.mrb[40].mxu1 }
 0x14f   :  { %v1957_v55 = vpop.f32.mrb[45].mxu0  ;;  %v1985_v20 = vpop.f32.mrb[41].mxu1 }
 0x150   :  { %1071 = vst [vmem:[%s2988_s9 + $0x48] sm:$0xff] %v1059_v19  ;;  %v1958_v31 = vadd.f32 %v1957_v55, %v1956_v21  ;;  %v1986_v10 = vadd.f32 %v1985_v20, %v1984_v25  ;;  %v1959_v32 = vpop.f32.mrb[46].mxu0  ;;  %v1987_v33 = vpop.f32.mrb[42].mxu1 }
 0x151   :  { %v1960_v34 = vpop.f32.mrb[47].mxu0  ;;  %v1988_v22 = vpop.f32.mrb[43].mxu1 }
 0x152   :  { %v1044_v61 = vadd.f32 %v1958_v31, %v963_v30  ;;  %v1961_v15 = vadd.f32 %v1960_v34, %v1959_v32  ;;  %v1989_v35 = vadd.f32 %v1988_v22, %v1987_v33  ;;  %v1444_v4 = vadd.f32 %v1986_v10, %v2921_v46 }
 0x154   :  { %v1060_v39 = vmax.f32 %v1044_v61, 0.0  ;;  %v1047_v43 = vadd.f32 %v1961_v15, %v966_v5  ;;  %v1447_v54 = vadd.f32 %v1989_v35, %v2921_v46 }
 0x156   :  { %1072 = vst [vmem:[%s2988_s9 + $0x50] sm:$0xff] %v1060_v39  ;;  %v1061_v47 = vmax.f32 %v1047_v43, 0.0  ;;  %v1990_v48 = vpop.f32.mrb[44].mxu1  ;;  %v2030_v50 = vpop.f32.mrb[48].mxu0 }
 0x157   :  { %v1991_v51 = vpop.f32.mrb[45].mxu1  ;;  %v2031_v52 = vpop.f32.mrb[49].mxu0 }
 0x158   :  { %1073 = vst [vmem:[%s2988_s9 + $0x58] sm:$0xff] %v1061_v47  ;;  %v1992_v53 = vadd.f32 %v1991_v51, %v1990_v48  ;;  %v2032_v13 = vadd.f32 %v2031_v52, %v2030_v50  ;;  %v1993_v8 = vpop.f32.mrb[46].mxu1  ;;  %v2033_v56 = vpop.f32.mrb[50].mxu0 }
 0x159   :  { %v1994_v57 = vpop.f32.mrb[47].mxu1  ;;  %v2034_v59 = vpop.f32.mrb[51].mxu0 }
 0x15a   :  { %v1995_v63 = vadd.f32 %v1994_v57, %v1993_v8  ;;  %v2035_v0 = vadd.f32 %v2034_v59, %v2033_v56  ;;  %v1517_v27 = vadd.f32 %v2032_v13, %v1436_v38  ;;  %v1452_v18 = vadd.f32 %v1992_v53, %v2921_v46 }
 0x15c   :  { %v2931_v37 = vadd.f32 %v2035_v0, %v1439_v26  ;;  %v1455_v3 = vadd.f32 %v1995_v63, %v2921_v46 }
 0x15e   :  { %v1996_v29 = vpop.f32.mrb[48].mxu1  ;;  %v2036_v28 = vpop.f32.mrb[52].mxu0 }
 0x15f   :  { %v1997_v1 = vpop.f32.mrb[49].mxu1  ;;  %v2037_v2 = vpop.f32.mrb[53].mxu0 }
 0x160   :  { %v1998_v9 = vadd.f32 %v1997_v1, %v1996_v29  ;;  %v2038_v7 = vadd.f32 %v2037_v2, %v2036_v28  ;;  %v1999_v11 = vpop.f32.mrb[50].mxu1  ;;  %v2039_v58 = vpop.f32.mrb[54].mxu0 }
 0x161   :  { %v2000_v14 = vpop.f32.mrb[51].mxu1  ;;  %v2040_v16 = vpop.f32.mrb[55].mxu0 }
 0x162   :  { %v2001_v45 = vadd.f32 %v2000_v14, %v1999_v11  ;;  %v2041_v17 = vadd.f32 %v2040_v16, %v2039_v58  ;;  %v1525_v40 = vadd.f32 %v2038_v7, %v1444_v4  ;;  %v1460_v32 = vadd.f32 %v1998_v9, %v2921_v46 }
 0x164   :  { %v1528_v49 = vadd.f32 %v2041_v17, %v1447_v54  ;;  %v1463_v35 = vadd.f32 %v2001_v45, %v2921_v46 }
 0x166   :  { %v2002_v41 = vpop.f32.mrb[52].mxu1  ;;  %v2042_v6 = vpop.f32.mrb[56].mxu0 }
 0x167   :  { %v2003_v12 = vpop.f32.mrb[53].mxu1  ;;  %v2043_v36 = vpop.f32.mrb[57].mxu0 }
 0x168   :  { %v2004_v42 = vadd.f32 %v2003_v12, %v2002_v41  ;;  %v2044_v62 = vadd.f32 %v2043_v36, %v2042_v6  ;;  %v2005_v44 = vpop.f32.mrb[54].mxu1  ;;  %v2045_v60 = vpop.f32.mrb[58].mxu0 }
 0x169   :  { %v2006_v23 = vpop.f32.mrb[55].mxu1  ;;  %v2046_v24 = vpop.f32.mrb[59].mxu0 }
 0x16a   :  { %v2007_v19 = vadd.f32 %v2006_v23, %v2005_v44  ;;  %v2047_v21 = vadd.f32 %v2046_v24, %v2045_v60  ;;  %v1533_v25 = vadd.f32 %v2044_v62, %v1452_v18  ;;  %v1468_v13 = vadd.f32 %v2004_v42, %v2921_v46 }
 0x16c   :  { %v1536_v55 = vadd.f32 %v2047_v21, %v1455_v3  ;;  %v1471_v26 = vadd.f32 %v2007_v19, %v2921_v46 }
 0x16e   :  { %v2008_v20 = vpop.f32.mrb[56].mxu1  ;;  %v2048_v30 = vpop.f32.mrb[60].mxu0 }
 0x16f   :  { %v2009_v31 = vpop.f32.mrb[57].mxu1  ;;  %v2049_v10 = vpop.f32.mrb[61].mxu0 }
 0x170   :  { %v2010_v33 = vadd.f32 %v2009_v31, %v2008_v20  ;;  %v2050_v34 = vadd.f32 %v2049_v10, %v2048_v30  ;;  %v2011_v22 = vpop.f32.mrb[58].mxu1  ;;  %v2051_v5 = vpop.f32.mrb[62].mxu0 }
 0x171   :  { %v2012_v61 = vpop.f32.mrb[59].mxu1  ;;  %v2052_v15 = vpop.f32.mrb[63].mxu0 }
 0x172   :  { %v2013_v39 = vadd.f32 %v2012_v61, %v2011_v22  ;;  %v2053_v43 = vadd.f32 %v2052_v15, %v2051_v5  ;;  %v1541_v47 = vadd.f32 %v2050_v34, %v1460_v32  ;;  %v1476_v45 = vadd.f32 %v2010_v33, %v2921_v46 }
 0x174   :  { %v1544_v48 = vadd.f32 %v2053_v43, %v1463_v35  ;;  %v1479_v6 = vadd.f32 %v2013_v39, %v2921_v46 }
 0x176   :  { %v2054_v50 = vpop.f32.mrb[64].mxu0  ;;  %v2126_v51 = vpop.f32.mrb[60].mxu1 }
 0x177   :  { %v1606_v52 = vadd.f32 %v2126_v51, %v1525_v40  ;;  %v2055_v38 = vpop.f32.mrb[65].mxu0  ;;  %v1597_v53 = vpop.f32.mrb[61].mxu1 }
 0x178   :  { %v2056_v8 = vadd.f32 %v2055_v38, %v2054_v50  ;;  %v1598_v56 = vadd.f32 %v1597_v53, %v1517_v27  ;;  %v2057_v57 = vpop.f32.mrb[66].mxu0  ;;  %v2127_v59 = vpop.f32.mrb[62].mxu1 }
 0x179   :  { %v1646_v63 = vmax.f32 %v1606_v52, 0.0  ;;  %v1609_v0 = vadd.f32 %v2127_v59, %v1528_v49  ;;  %v2058_v29 = vpop.f32.mrb[67].mxu0  ;;  %v1600_v28 = vpop.f32.mrb[63].mxu1 }
 0x17a   :  { %v1644_v1 = vmax.f32 %v1598_v56, 0.0  ;;  %v2059_v2 = vadd.f32 %v2058_v29, %v2057_v57  ;;  %v1601_v4 = vadd.f32 %v1600_v28, %v2931_v37  ;;  %v1549_v9 = vadd.f32 %v2056_v8, %v1468_v13 }
 0x17b   :  { %1658 = vst [vmem:[%s2990_s10 + $0x10] sm:$0xff] %v1646_v63  ;;  %v1647_v7 = vmax.f32 %v1609_v0, 0.0 }
 0x17c   :  { %1656 = vst [vmem:[%s2990_s10] sm:$0xff] %v1644_v1  ;;  %v1645_v27 = vmax.f32 %v1601_v4, 0.0  ;;  %v1552_v11 = vadd.f32 %v2059_v2, %v1471_v26 }
 0x17d   :  { %1659 = vst [vmem:[%s2990_s10 + $0x18] sm:$0xff] %v1647_v7 }
 0x17e   :  { %1657 = vst [vmem:[%s2990_s10 + $0x8] sm:$0xff] %v1645_v27  ;;  %v2060_v37 = vpop.f32.mrb[68].mxu0  ;;  %v2130_v58 = vpop.f32.mrb[64].mxu1 }
 0x17f   :  { %v1622_v14 = vadd.f32 %v2130_v58, %v1541_v47  ;;  %v2061_v16 = vpop.f32.mrb[69].mxu0  ;;  %v1613_v54 = vpop.f32.mrb[65].mxu1 }
 0x180   :  { %v2062_v17 = vadd.f32 %v2061_v16, %v2060_v37  ;;  %v1614_v40 = vadd.f32 %v1613_v54, %v1533_v25  ;;  %v2063_v49 = vpop.f32.mrb[70].mxu0  ;;  %v2131_v41 = vpop.f32.mrb[66].mxu1 }
 0x181   :  { %v1650_v12 = vmax.f32 %v1622_v14, 0.0  ;;  %v1625_v36 = vadd.f32 %v2131_v41, %v1544_v48  ;;  %v2064_v18 = vpop.f32.mrb[71].mxu0  ;;  %v1616_v42 = vpop.f32.mrb[67].mxu1 }
 0x182   :  { %v1648_v62 = vmax.f32 %v1614_v40, 0.0  ;;  %v2065_v44 = vadd.f32 %v2064_v18, %v2063_v49  ;;  %v1617_v60 = vadd.f32 %v1616_v42, %v1536_v55  ;;  %v1557_v23 = vadd.f32 %v2062_v17, %v1476_v45 }
 0x183   :  { %1662 = vst [vmem:[%s2990_s10 + $0x30] sm:$0xff] %v1650_v12  ;;  %v1651_v24 = vmax.f32 %v1625_v36, 0.0 }
 0x184   :  { %1660 = vst [vmem:[%s2990_s10 + $0x20] sm:$0xff] %v1648_v62  ;;  %v1649_v3 = vmax.f32 %v1617_v60, 0.0  ;;  %v1560_v19 = vadd.f32 %v2065_v44, %v1479_v6 }
 0x185   :  { %1663 = vst [vmem:[%s2990_s10 + $0x38] sm:$0xff] %v1651_v24 }
 0x186   :  { %1661 = vst [vmem:[%s2990_s10 + $0x28] sm:$0xff] %v1649_v3  ;;  %v2134_v46 = vpop.f32.mrb[68].mxu1 }
 0x187   :  { %v1638_v21 = vadd.f32 %v2134_v46, %v1557_v23  ;;  %v1629_v25 = vpop.f32.mrb[69].mxu1 }
 0x188   :  { %v1630_v55 = vadd.f32 %v1629_v25, %v1549_v9  ;;  %v2135_v20 = vpop.f32.mrb[70].mxu1 }
 0x189   :  { %v1654_v30 = vmax.f32 %v1638_v21, 0.0  ;;  %v1641_v31 = vadd.f32 %v2135_v20, %v1560_v19  ;;  %v1632_v10 = vpop.f32.mrb[71].mxu1 }
 0x18a   :  { %v1652_v32 = vmax.f32 %v1630_v55, 0.0  ;;  %v1633_v33 = vadd.f32 %v1632_v10, %v1552_v11 }
 0x18b   :  { %1666 = vst [vmem:[%s2990_s10 + $0x50] sm:$0xff] %v1654_v30  ;;  %v1655_v34 = vmax.f32 %v1641_v31, 0.0 }
 0x18c   :  { %1664 = vst [vmem:[%s2990_s10 + $0x40] sm:$0xff] %v1652_v32  ;;  %v1653_v22 = vmax.f32 %v1633_v33, 0.0 }
 0x18d   :  { %1667 = vst [vmem:[%s2990_s10 + $0x58] sm:$0xff] %v1655_v34 }
 0x18e   :  { %1665 = vst [vmem:[%s2990_s10 + $0x48] sm:$0xff] %v1653_v22 }

</bundles_post_ra>
